<compile_context>
chip_gen: v6e
topology: v6e:2x2x1
jax: 0.10.0
libtpu: 0.0.40
codegen_flags: <defaults>
</compile_context>

<pallas_src>
import functools

import jax
import jax.numpy as jnp
from jax import lax
from jax.experimental import pallas as pl
from jax.experimental.pallas import tpu as pltpu


def _ce_kernel(pred_ref, tgt_ref, mask_ref, num_ref, den_ref, *,
               hw, t_hw, needs_mask):
    logits = pred_ref[0].astype(jnp.float32)       # (C, t_hw)  classes on sublanes
    tgt = tgt_ref[0].astype(jnp.int32)             # (1, t_hw)
    maskf = mask_ref[0].astype(jnp.float32)        # (1, t_hw)

    # Stable log-sum-exp + one-hot target gather over the (sublane) class axis.
    # Full-shape (C, t_hw) VPU ops + XLU sublane reductions; everything is
    # lane-wise over the pixel axis, so each pixel is independent.
    m = jnp.max(logits, axis=0, keepdims=True)                       # (1, t_hw)
    cls = lax.broadcasted_iota(jnp.int32, logits.shape, 0)
    picked = jnp.sum(jnp.where(cls == tgt, logits, 0.0),
                     axis=0, keepdims=True)                          # (1, t_hw)
    sum_exp = jnp.sum(jnp.exp(logits - m), axis=0, keepdims=True)
    loss = m + jnp.log(sum_exp) - picked                             # per-pixel CE

    def write(num, den):
        # Lane-broadcast the two partial scalars into tiny (1, 128) out tiles.
        num_ref[...] = jnp.broadcast_to(num.astype(jnp.float32), num_ref.shape)
        den_ref[...] = jnp.broadcast_to(den.astype(jnp.float32), den_ref.shape)

    if not needs_mask:
        write(jnp.sum(loss * maskf), jnp.sum(maskf))
    else:
        # Only the final spatial block can read past H*W; only it pays for the
        # remainder masking.  jnp.where does not propagate garbage/NaN from the
        # unselected branch, so mask loss and mask separately before the product
        # (avoids 0 * inf).
        s = pl.program_id(1)
        is_last = s == pl.num_programs(1) - 1

        @pl.when(jnp.logical_not(is_last))
        def _():
            write(jnp.sum(loss * maskf), jnp.sum(maskf))

        @pl.when(is_last)
        def _():
            lane = lax.broadcasted_iota(jnp.int32, (1, t_hw), 1)
            valid = (s * t_hw + lane) < hw
            safe_loss = jnp.where(valid, loss, 0.0)
            safe_mask = jnp.where(valid, maskf, 0.0)
            write(jnp.sum(safe_loss * safe_mask), jnp.sum(safe_mask))


def _vmem_limit_bytes():
    """Scoped VMEM limit: big enough for large tiles, safe on v7x (64 MiB phys)."""
    try:
        info = pltpu.get_tpu_info()
        phys = getattr(info, "vmem_capacity_bytes", 64 * 1024 * 1024)
    except Exception:  # pragma: no cover - be conservative if the query fails
        phys = 64 * 1024 * 1024
    return int(min(phys - 8 * 1024 * 1024, 96 * 1024 * 1024))


def _pick_tile(C, HW, itemsizes, *, vmem_budget, max_tile=65536):
    """Pixels per grid step: lane-dense, MiB-scale, and VMEM-budget safe."""
    pred_b, tgt_b, mask_b = itemsizes
    per_pixel = 2 * (C * pred_b + tgt_b + mask_b)   # double-buffered input streams
    t = min(vmem_budget // max(per_pixel, 1), max_tile, HW)
    if t >= HW:
        return HW                                   # single spatial block (full dim)
    if t < 128:
        return min(128, HW)                         # degenerate (huge C) fallback
    t = (t // 128) * 128                            # keep the lane axis 128-aligned
    # Prefer a multiple-of-128 divisor of HW near the target so no grid step
    # needs remainder masking.
    d = t
    while d >= max(128, t // 2):
        if HW % d == 0:
            return d
        d -= 128
    return t


@functools.partial(jax.jit, static_argnames=("t_hw", "vmem_limit"))
def _ce_loss_impl(pred, target, mask, *, t_hw, vmem_limit):
    N, C, H, W = pred.shape
    HW = H * W

    # Free, layout-preserving reshapes (no transpose, no pad, no dtype widening:
    # casts happen in-kernel so narrow inputs stay narrow in HBM).
    pred3 = pred.reshape(N, C, HW)
    tgt3 = target.reshape(N, 1, HW)
    mask3 = mask.reshape(N, 1, HW)

    grid_s = pl.cdiv(HW, t_hw)
    needs_mask = (HW % t_hw) != 0

    kernel = functools.partial(_ce_kernel, hw=HW, t_hw=t_hw, needs_mask=needs_mask)

    num_out, den_out = pl.pallas_call(
        kernel,
        out_shape=(
            jax.ShapeDtypeStruct((N, grid_s, 1, 128), jnp.float32),
            jax.ShapeDtypeStruct((N, grid_s, 1, 128), jnp.float32),
        ),
        grid=(N, grid_s),
        in_specs=[
            pl.BlockSpec((1, C, t_hw), lambda n, s: (n, 0, s)),
            pl.BlockSpec((1, 1, t_hw), lambda n, s: (n, 0, s)),
            pl.BlockSpec((1, 1, t_hw), lambda n, s: (n, 0, s)),
        ],
        out_specs=(
            pl.BlockSpec((1, 1, 1, 128), lambda n, s: (n, s, 0, 0)),
            pl.BlockSpec((1, 1, 1, 128), lambda n, s: (n, s, 0, 0)),
        ),
        compiler_params=pltpu.CompilerParams(
            dimension_semantics=("parallel", "parallel"),
            vmem_limit_bytes=vmem_limit),
    )(pred3, tgt3, mask3)

    num = jnp.sum(num_out[:, :, 0, 0])
    den = jnp.sum(den_out[:, :, 0, 0])
    # Matches the PyTorch expression exactly (inf/nan if mask.sum() == 0).
    return num / den


def ce_loss(pred, target, mask, *, t_hw=None):
    """pred: (N, C, H, W) float logits; target: (N, H, W) int; mask: (N, H, W)."""
    N, C, H, W = pred.shape
    HW = H * W

    if (not jnp.issubdtype(target.dtype, jnp.integer)) or target.dtype.itemsize > 4:
        target = target.astype(jnp.int32)

    vmem_limit = _vmem_limit_bytes()
    if t_hw is None:
        budget = max(vmem_limit - 6 * 1024 * 1024, 8 * 1024 * 1024)
        t_hw = _pick_tile(
            C, HW,
            (pred.dtype.itemsize, target.dtype.itemsize, mask.dtype.itemsize),
            vmem_budget=budget)

    # v7x has 2 TensorCores: make sure the (parallel) grid has >= 2 steps.
    grid_s = pl.cdiv(HW, t_hw)
    if N * grid_s < 2 and HW >= 256:
        t_hw = max(128, (HW // 2) // 128 * 128)

    return _ce_loss_impl(pred, target, mask, t_hw=t_hw, vmem_limit=vmem_limit)


def _ce_loss_ref(pred, target, mask):
    # Pure-JAX reference mirroring torch.nn.CrossEntropyLoss(reduce=False).
    logits = jnp.transpose(pred, (0, 2, 3, 1)).astype(jnp.float32)  # NHWC
    logz = jax.nn.logsumexp(logits, axis=-1)
    picked = jnp.take_along_axis(logits, target[..., None], axis=-1)[..., 0]
    loss = logz - picked
    m = mask.astype(jnp.float32)
    return (loss * m).sum() / m.sum()


if __name__ == "__main__":
    key = jax.random.PRNGKey(0)
    k1, k2, k3 = jax.random.split(key, 3)

    N, C, H, W = 2, 4, 16, 16
    pred = jax.random.normal(k1, (N, C, H, W), dtype=jnp.float32)
    target = jax.random.randint(k2, (N, H, W), 0, C, dtype=jnp.int32)
    mask = (jax.random.uniform(k3, (N, H, W)) > 0.3).astype(jnp.float32)

    out = ce_loss(pred, target, mask)
    out = jax.block_until_ready(out)

    ref = _ce_loss_ref(pred, target, mask)
    assert jnp.allclose(out, ref, rtol=1e-5, atol=1e-5), (out, ref)

    print("KERNEL_OK")
</pallas_src>

<mosaic_0001>
module attributes {stable_mosaic.version = 11 : i64} {
  func.func @_ce_kernel(%arg0: i32, %arg1: i32, %arg2: memref<1x4x256xf32, #tpu.memory_space<vmem>>, %arg3: memref<1x1x256xi32, #tpu.memory_space<vmem>>, %arg4: memref<1x1x256xf32, #tpu.memory_space<vmem>>, %arg5: memref<1x1x1x128xf32, #tpu.memory_space<vmem>>, %arg6: memref<1x1x1x128xf32, #tpu.memory_space<vmem>>) attributes {dimension_semantics = [#tpu.dimension_semantics<parallel>, #tpu.dimension_semantics<parallel>], iteration_bounds = array<i64: 2, 1>, scalar_prefetch = 0 : i64, scratch_operands = 0 : i64, tpu.core_type = #tpu.core_type<tc>, window_params = [{transform_indices = @transform_0, window_bounds = array<i64: 1, 4, 256>}, {transform_indices = @transform_1, window_bounds = array<i64: 1, 1, 256>}, {transform_indices = @transform_2, window_bounds = array<i64: 1, 1, 256>}, {transform_indices = @transform_3, window_bounds = array<i64: 1, 1, 1, 128>}, {transform_indices = @transform_4, window_bounds = array<i64: 1, 1, 1, 128>}]} {
    %c0 = arith.constant 0 : index
    %c0_0 = arith.constant 0 : index
    %c0_1 = arith.constant 0 : index
    %0 = vector.load %arg2[%c0, %c0_0, %c0_1] : memref<1x4x256xf32, #tpu.memory_space<vmem>>, vector<1x4x256xf32>
    %1 = vector.shape_cast %0 : vector<1x4x256xf32> to vector<4x256xf32>
    %c0_2 = arith.constant 0 : index
    %c0_3 = arith.constant 0 : index
    %c0_4 = arith.constant 0 : index
    %2 = vector.load %arg3[%c0_2, %c0_3, %c0_4] : memref<1x1x256xi32, #tpu.memory_space<vmem>>, vector<1x1x256xi32>
    %3 = vector.shape_cast %2 : vector<1x1x256xi32> to vector<1x256xi32>
    %c0_5 = arith.constant 0 : index
    %c0_6 = arith.constant 0 : index
    %c0_7 = arith.constant 0 : index
    %4 = vector.load %arg4[%c0_5, %c0_6, %c0_7] : memref<1x1x256xf32, #tpu.memory_space<vmem>>, vector<1x1x256xf32>
    %5 = vector.shape_cast %4 : vector<1x1x256xf32> to vector<1x256xf32>
    %cst = arith.constant dense<0xFF800000> : vector<256xf32>
    %6 = vector.multi_reduction <maximumf>, %1, %cst [0] : vector<4x256xf32> to vector<256xf32>
    %7 = vector.shape_cast %6 : vector<256xf32> to vector<1x256xf32>
    %8 = tpu.iota {dimensions = array<i32: 0>} : vector<4x256xi32>
    %9 = vector.broadcast %3 : vector<1x256xi32> to vector<4x256xi32>
    %10 = arith.cmpi eq, %8, %9 : vector<4x256xi32>
    %cst_8 = arith.constant 0.000000e+00 : f32
    %11 = vector.broadcast %cst_8 : f32 to vector<4x256xf32>
    %12 = arith.select %10, %1, %11 : vector<4x256xi1>, vector<4x256xf32>
    %cst_9 = arith.constant dense<0.000000e+00> : vector<256xf32>
    %13 = vector.multi_reduction <add>, %12, %cst_9 [0] : vector<4x256xf32> to vector<256xf32>
    %14 = vector.shape_cast %13 : vector<256xf32> to vector<1x256xf32>
    %15 = vector.broadcast %7 : vector<1x256xf32> to vector<4x256xf32>
    %16 = arith.subf %1, %15 : vector<4x256xf32>
    %17 = math.exp %16 : vector<4x256xf32>
    %cst_10 = arith.constant dense<0.000000e+00> : vector<256xf32>
    %18 = vector.multi_reduction <add>, %17, %cst_10 [0] : vector<4x256xf32> to vector<256xf32>
    %19 = vector.shape_cast %18 : vector<256xf32> to vector<1x256xf32>
    %20 = math.log %19 : vector<1x256xf32>
    %21 = arith.addf %7, %20 : vector<1x256xf32>
    %22 = arith.subf %21, %14 : vector<1x256xf32>
    %23 = arith.mulf %22, %5 : vector<1x256xf32>
    %24 = vector.shape_cast %23 : vector<1x256xf32> to vector<1x1x256xf32>
    %cst_11 = arith.constant dense<0.000000e+00> : vector<1xf32>
    %25 = vector.multi_reduction <add>, %24, %cst_11 [1, 2] : vector<1x1x256xf32> to vector<1xf32>
    %26 = vector.shape_cast %25 : vector<1xf32> to vector<1x1x1xf32>
    %27 = vector.extract %26[0, 0, 0] : f32 from vector<1x1x1xf32>
    %28 = vector.shape_cast %5 : vector<1x256xf32> to vector<1x1x256xf32>
    %cst_12 = arith.constant dense<0.000000e+00> : vector<1xf32>
    %29 = vector.multi_reduction <add>, %28, %cst_12 [1, 2] : vector<1x1x256xf32> to vector<1xf32>
    %30 = vector.shape_cast %29 : vector<1xf32> to vector<1x1x1xf32>
    %31 = vector.extract %30[0, 0, 0] : f32 from vector<1x1x1xf32>
    %32 = vector.broadcast %27 : f32 to vector<1x1x1x128xf32>
    %c0_13 = arith.constant 0 : index
    %c0_14 = arith.constant 0 : index
    %c0_15 = arith.constant 0 : index
    %c0_16 = arith.constant 0 : index
    %33 = vector.load %arg5[%c0_13, %c0_14, %c0_15, %c0_16] : memref<1x1x1x128xf32, #tpu.memory_space<vmem>>, vector<1x1x1x128xf32>
    tpu.vector_store %arg5[%c0_13, %c0_14, %c0_15, %c0_16], %32 {strides = array<i32>} : memref<1x1x1x128xf32, #tpu.memory_space<vmem>>, vector<1x1x1x128xf32>,
    %34 = vector.broadcast %31 : f32 to vector<1x1x1x128xf32>
    %c0_17 = arith.constant 0 : index
    %c0_18 = arith.constant 0 : index
    %c0_19 = arith.constant 0 : index
    %c0_20 = arith.constant 0 : index
    %35 = vector.load %arg6[%c0_17, %c0_18, %c0_19, %c0_20] : memref<1x1x1x128xf32, #tpu.memory_space<vmem>>, vector<1x1x1x128xf32>
    tpu.vector_store %arg6[%c0_17, %c0_18, %c0_19, %c0_20], %34 {strides = array<i32>} : memref<1x1x1x128xf32, #tpu.memory_space<vmem>>, vector<1x1x1x128xf32>,
    return
  }
  func.func @transform_0(%arg0: i32, %arg1: i32) -> (i32, i32, i32) {
    %c0_i32 = arith.constant 0 : i32
    %c0_i32_0 = arith.constant 0 : i32
    return %arg0, %c0_i32, %arg1 : i32, i32, i32
  }
  func.func @transform_1(%arg0: i32, %arg1: i32) -> (i32, i32, i32) {
    %c0_i32 = arith.constant 0 : i32
    %c0_i32_0 = arith.constant 0 : i32
    return %arg0, %c0_i32, %arg1 : i32, i32, i32
  }
  func.func @transform_2(%arg0: i32, %arg1: i32) -> (i32, i32, i32) {
    %c0_i32 = arith.constant 0 : i32
    %c0_i32_0 = arith.constant 0 : i32
    return %arg0, %c0_i32, %arg1 : i32, i32, i32
  }
  func.func @transform_3(%arg0: i32, %arg1: i32) -> (i32, i32, i32, i32) {
    %c0_i32 = arith.constant 0 : i32
    %c0_i32_0 = arith.constant 0 : i32
    %c0_i32_1 = arith.constant 0 : i32
    return %arg0, %arg1, %c0_i32, %c0_i32_0 : i32, i32, i32, i32
  }
  func.func @transform_4(%arg0: i32, %arg1: i32) -> (i32, i32, i32, i32) {
    %c0_i32 = arith.constant 0 : i32
    %c0_i32_0 = arith.constant 0 : i32
    %c0_i32_1 = arith.constant 0 : i32
    return %arg0, %arg1, %c0_i32, %c0_i32_0 : i32, i32, i32, i32
  }
}

</mosaic_0001>

<bundles_post_ra>
// kernel: _ce_loss_impl.1
= control target key start
LH: loop header
LB: loop body
LE: loop exit
PB: predicated region body
PF: predicated region fallthrough
CT: control target
= control target key end

     0   :  { %s668_s15 = smov 0   ;;  %s670_s16 = smov 0   ;;  %s726_s0 = inlined_call_operand.vmem [shape: f32[2,4,256], index: 0, kind: input, shape index: {}]   ;;  %s727_s1 = inlined_call_operand.vmem [shape: s32[2,1,256], index: 1, kind: input, shape index: {}]   ;;  %s728_s2 = inlined_call_operand.vmem [shape: f32[2,1,256], index: 2, kind: input, shape index: {}]   ;;  %s729_s3 = inlined_call_operand.vmem [shape: f32[2,1,1,128], index: 3, kind: output, shape index: {0}]   ;;  %s730_s4 = inlined_call_operand.vmem [shape: f32[2,1,1,128], index: 4, kind: output, shape index: {1}]  }
   0x1   :  { %s672_s17 = smov 0  }
   0x2 LB: > { %s27_s18 = sadd.s32 1, %s637_s16  ;;  %p576_p0 = scmp.ge.s32.totalorder %s641_s17, 1  ;;  %s641_s17 = sphi %s672_s17, %s15_s17   ;;  %s637_s16 = sphi %s670_s16, %s732_s16   ;;  %s633_s15 = sphi %s668_s15, %s731_s15  }
   0x3   : > { %p29_p1 = scmp.ge.s32.totalorder %s27_s18, 2  ;;  %p220_p2 = scmp.lt.s32.totalorder %s641_s17, 3 }
   0x5   : > { %s734_s18 = smov (%p29_p1, %s27_s18), 0  ;;  %p221_p3 = pnand %p576_p0, %p220_p2 }
   0x6   : > { %p274_p4 = scmp.lt.s32.totalorder (!%p221_p3), %s633_s15, 1 }
   0x7   : > { %224 = sbr.rel (%p221_p3) target bundleno = 297 (0x129), region = 32 }
   0xc   : > { %s736_s15 = smov (!%p274_p4, %s633_s15), 1  ;;  %vm319_vm0 = vcmask 1043456   ;;  %v334_v17 = vlaneseq  ;;  %vm407_vm3 = vcmask 1040384  }
   0xd   : > { %s583_s19 = sshll.u32 %s736_s15, 3  ;;  %s579_s23 = sshll.u32 %s736_s15, 1 }
   0xe   : > { %s281_s22 = scalar_lea.vmem %s726_s0, %s583_s19  ;;  %v335_v20 = vshrl.u32 %v334_v17, 7  ;;  %s290_s26 = scalar_lea.vmem %s727_s1, %s579_s23 }
   0xf   : > { %v313_v0 = vld [vmem:[%s281_s22] sm:$0xff]  ;;  %s299_s29 = scalar_lea.vmem %s728_s2, %s579_s23  ;;  %s306_s6 = scalar_lea.vmem %s729_s3, %s736_s15 }
  0x10   : > { %v317_v1 = vcombine.high %v313_v0, %v313_v0  ;;  %v320_v2 = vsel %vm319_vm0, %v313_v0, -inf  ;;  %v338_v21 = vsub.s32 0, %v335_v20  ;;  %v314_v22 = vld [vmem:[%s290_s26] sm:$0x3]  ;;  %v342_v23 = vsub.s32 1, %v335_v20  ;;  %s312_s10 = scalar_lea.vmem %s730_s4, %s736_s15 }
  0x11   : > { %v321_v3 = vrot.slane %v320_v2, 4  ;;  %v315_v57 = vld [vmem:[%s299_s29] sm:$0x3] }
  0x12   : > { %v327_v4 = vsel %vm319_vm0, %v317_v1, -inf  ;;  %v339_v24 = vrot.slane %v314_v22, %v338_v21  ;;  %v343_v25 = vrot.slane %v314_v22, %v342_v23 }
  0x13   : > { %v322_v5 = vmax.f32 %v320_v2, %v321_v3  ;;  %v328_v6 = vrot.slane %v327_v4, 4  ;;  %v402_v3 = vrot.slane %v315_v57, %v342_v23 }
  0x14   : > { %vm344_vm1 = vcmp.eq.s32.totalorder %v335_v20, %v339_v24  ;;  %vm345_vm2 = vcmp.eq.s32.totalorder %v335_v20, %v343_v25 }
  0x15   : > { %v323_v7 = vrot.slane %v322_v5, 2  ;;  %v329_v8 = vmax.f32 %v327_v4, %v328_v6  ;;  %v346_v29 = vsel %vm344_vm1, %v313_v0, 0.0  ;;  %v347_v32 = vsel %vm345_vm2, %v317_v1, 0.0 }
  0x16   : > { %v348_v35 = vsel %vm319_vm0, %v346_v29, 0.0  ;;  %v355_v38 = vsel %vm319_vm0, %v347_v32, 0.0 }
  0x17   : > { %v324_v9 = vmax.f32 %v322_v5, %v323_v7  ;;  %v330_v10 = vrot.slane %v329_v8, 2  ;;  %v349_v39 = vrot.slane %v348_v35, 4  ;;  %v356_v42 = vrot.slane %v355_v38, 4 }
  0x19   : > { %v325_v11 = vrot.slane %v324_v9, 1  ;;  %v331_v12 = vmax.f32 %v329_v8, %v330_v10  ;;  %v350_v45 = vadd.f32 %v349_v39, %v348_v35  ;;  %v357_v48 = vadd.f32 %v356_v42, %v355_v38 }
  0x1a   : > { %v421_v10 = vsel %vm407_vm3, %v402_v3, 0.0 }
  0x1b   : > { %v326_v13 = vmax.f32 %v324_v9, %v325_v11  ;;  %v332_v14 = vrot.slane %v331_v12, 1  ;;  %v351_v50 = vrot.slane %v350_v45, 2  ;;  %v358_v51 = vrot.slane %v357_v48, 2 }
  0x1d   : > { %v333_v15 = vmax.f32 %v331_v12, %v332_v14  ;;  %v352_v52 = vadd.f32 %v351_v50, %v350_v45  ;;  %v359_v53 = vadd.f32 %v358_v51, %v357_v48 }
  0x1f   : > { %v364_v16 = vcombine.low %v326_v13, %v333_v15  ;;  %v353_v54 = vrot.slane %v352_v52, 1  ;;  %v360_v55 = vrot.slane %v359_v53, 1 }
  0x21   : > { %v366_v18 = vsub.f32 %v313_v0, %v364_v16  ;;  %v354_v58 = vadd.f32 %v353_v54, %v352_v52  ;;  %v361_v61 = vadd.f32 %v360_v55, %v359_v53  ;;  %v398_v0 = vrot.slane %v315_v57, %v338_v21 }
  0x23   : > { %v367_v19 = vmul.f32 1.442695, %v366_v18  ;;  %v420_v9 = vsel %vm407_vm3, %v398_v0, 0.0 }
  0x24   : > { %v422_v12 = vadd.f32 %v421_v10, %v420_v9 }
  0x25   : > { %613 = vpow2.f32 %v367_v19 }
  0x32   : > { %v614_v26 = vpop.eup %613 }
  0x33   : > { %v370_v27 = vcombine.high %v614_v26, %v614_v26  ;;  %v372_v28 = vsel %vm319_vm0, %v614_v26, 0.0 }
  0x34   : > { %v373_v30 = vrot.slane %v372_v28, 4 }
  0x35   : > { %v379_v31 = vsel %vm319_vm0, %v370_v27, 0.0 }
  0x36   : > { %v374_v33 = vadd.f32 %v373_v30, %v372_v28  ;;  %v380_v34 = vrot.slane %v379_v31, 4 }
  0x38   : > { %v375_v36 = vrot.slane %v374_v33, 2  ;;  %v381_v37 = vadd.f32 %v380_v34, %v379_v31 }
  0x3a   : > { %v376_v40 = vadd.f32 %v375_v36, %v374_v33  ;;  %v382_v41 = vrot.slane %v381_v37, 2 }
  0x3c   : > { %v377_v43 = vrot.slane %v376_v40, 1  ;;  %v383_v44 = vadd.f32 %v382_v41, %v381_v37 }
  0x3e   : > { %v378_v46 = vadd.f32 %v377_v43, %v376_v40  ;;  %v384_v47 = vrot.slane %v383_v44, 1 }
  0x40   : > { %v385_v49 = vadd.f32 %v384_v47, %v383_v44  ;;  %615 = vlog2.f32 %v378_v46 }
  0x42   : > { %617 = vlog2.f32 %v385_v49 }
  0x4d   : > { %v616_v56 = vpop.eup %615 }
  0x4e   : > { %v387_v59 = vmul.f32 0.6931472, %v616_v56 }
  0x4f   : > { %v618_v60 = vpop.eup %617 }
  0x50   : > { %v389_v62 = vmul.f32 0.6931472, %v618_v60  ;;  %v390_v63 = vadd.f32 %v387_v59, %v326_v13 }
  0x52   : > { %v391_v1 = vadd.f32 %v389_v62, %v333_v15  ;;  %v392_v2 = vsub.f32 %v390_v63, %v354_v58 }
  0x54   : > { %v393_v4 = vsub.f32 %v391_v1, %v361_v61  ;;  %v405_v5 = vmul.f32 %v398_v0, %v392_v2 }
  0x56   : > { %v406_v6 = vmul.f32 %v402_v3, %v393_v4  ;;  %v408_v7 = vsel %vm407_vm3, %v405_v5, 0.0 }
  0x58   : > { %v409_v8 = vsel %vm407_vm3, %v406_v6, 0.0 }
  0x59   : > { %v410_v11 = vadd.f32 %v409_v8, %v408_v7 }
  0x5b   : > { %411 = vadd.xlane.f32.xlu0 %v410_v11 }
  0x5f   : > { %423 = vadd.xlane.f32.xlu0 %v422_v12 }
  0xe4   : > { %v412_v14 = vpop.xlane.xlu0 %411 }
  0xe5   : > { %v413_v16 = vrot.slane %v412_v14, 4 }
  0xe7   : > { %v414_v13 = vadd.f32 %v413_v16, %v412_v14 }
  0xe8   : > { %v424_v17 = vpop.xlane.xlu0 %423 }
  0xe9   : > { %v415_v15 = vrot.slane %v414_v13, 2  ;;  %v425_v18 = vrot.slane %v424_v17, 4 }
  0xeb   : > { %v426_v19 = vadd.f32 %v425_v18, %v424_v17  ;;  %v416_v20 = vadd.f32 %v415_v15, %v414_v13 }
  0xed   : > { %v427_v21 = vrot.slane %v426_v19, 2  ;;  %v417_v22 = vrot.slane %v416_v20, 1 }
  0xef   : > { %v428_v23 = vadd.f32 %v427_v21, %v426_v19  ;;  %v418_v24 = vadd.f32 %v417_v22, %v416_v20 }
  0xf1   : > { %584 = vpush %v418_v24  ;;  %v429_v25 = vrot.slane %v428_v23, 1 }
  0xf3   : > { %v430_v26 = vadd.f32 %v429_v25, %v428_v23 }
  0xf5   : > { %586 = vpush %v430_v26 }
 0x122   : > { %s585_s7 = spop %584 }
 0x123   : > { %v432_v27 = vstv %s585_s7 }
 0x124   : > { %433 = vst [vmem:[%s306_s6] sm:$0x1] %v432_v27 }
 0x126   : > { %s587_s11 = spop %586 }
 0x127   : > { %v434_v28 = vstv %s587_s11 }
 0x128   : > { %435 = vst [vmem:[%s312_s10] sm:$0x1] %v434_v28 }
 0x129 PF: > { %s15_s17 = sadd.s32 1, %s641_s17   ;;  %s731_s15 = smov %s637_s16 }
 0x12a   : > { %p12_p5 = scmp.ge.s32.totalorder %s15_s17, 4   ;;  %s732_s16 = smov %s734_s18 }
 0x12c   :  { %14 = sbr.rel (!%p12_p5) target bundleno = 2 (0x2), region = 80 }

</bundles_post_ra>
